<compile_context>
chip_gen: v7x
topology: tpu7x:2x2x1
jax: 0.10.0
libtpu: 0.0.40
codegen_flags: <defaults>
</compile_context>

<pallas_src>
import functools
import math

import jax
import jax.numpy as jnp
from jax.experimental import pallas as pl
from jax.experimental.pallas import tpu as pltpu

_MIB = 1024 * 1024


# --------------------------------------------------------------------------
# Helpers
# --------------------------------------------------------------------------
def _cdiv(a, b):
    return -(-a // b)


def _ceil_to(x, m):
    return _cdiv(x, m) * m


def _default_vmem_limit_bytes():
    """~50% of physical per-core VMEM, clamped to [32 MiB, 64 MiB].

    v5e/v6e (128 MiB/TC) -> 64 MiB scoped; v7x (64 MiB/TC) -> 32 MiB scoped.
    Falls back to 40 MiB when the query is unavailable.
    """
    try:
        cap = int(getattr(pltpu.get_tpu_info(), "vmem_capacity_bytes"))
        return int(min(64 * _MIB, max(32 * _MIB, cap // 2)))
    except Exception:
        return 40 * _MIB


def _sublane_multiple(*dtypes):
    # f32 -> 8 rows per sublane tile, bf16/f16 -> 16, int8/fp8 -> 32.
    return max(max(8, 32 // jnp.dtype(d).itemsize) for d in dtypes)


def _pick_tile_rows(n_rows, stream_bytes_per_row, interm_bytes_per_row,
                    sublane, vmem_limit_bytes, target_step_bytes=16 * _MIB):
    """Batch-tile picker.

    * byte-based cap: each grid step streams ~`target_step_bytes` of HBM
      traffic (x + t + out) so the ~0.35 us per-step overhead is amortized;
    * VMEM upper bound that includes the double-buffered streams AND the f32
      compute intermediates, against 75% of the scoped limit (headroom for
      compiler scratch);
    * sublane-aligned, and an even (>= 2) grid step count when the batch
      allows it so v7x's two TensorCores stay balanced.
    """
    if n_rows <= sublane:
        return n_rows                                   # one block == whole batch

    budget = int(vmem_limit_bytes * 0.75)
    per_row_vmem = 2 * stream_bytes_per_row + interm_bytes_per_row  # x2: dbl-buffer
    tm_vmem = budget // max(per_row_vmem, 1)
    tm_tgt = target_step_bytes // max(stream_bytes_per_row, 1)

    tm = min(tm_vmem, tm_tgt, n_rows)
    tm = max(sublane, (tm // sublane) * sublane)

    if n_rows >= 2 * sublane:
        steps = _cdiv(n_rows, tm)
        if steps < 2 or steps % 2:
            steps = max(2, steps + (steps % 2))
            tm = min(n_rows, _ceil_to(_cdiv(n_rows, steps), sublane))
    return max(tm, 1)


# --------------------------------------------------------------------------
# Single-pass kernel (whole class extent in one row block)
# --------------------------------------------------------------------------
def _cross_entropy_kernel(x_ref, t_ref, o_ref, *, groups, classes):
    """One (tm, groups*classes) tile: -t * log_softmax per `classes` segment."""
    x_in = x_ref[...]

    if groups == 1:
        # Row max on the storage dtype (ordering identical to f32); only the
        # reduced per-row value is upcast -> one fewer full-tile f32 temp.
        m = jnp.max(x_in, axis=-1, keepdims=True).astype(jnp.float32)
        s = x_in.astype(jnp.float32) - m
        # NOTE(v7x): with bf16 I/O this kernel can flip from HBM-bound to
        # EUP-bound (one exp/element, single transcendental pipe, ~2.5x the
        # HBM bandwidth of v6e); re-derive the binding unit there before
        # spending more effort on memory-side tuning.
        nlse = jnp.log(jnp.sum(jnp.exp(s), axis=-1, keepdims=True))
        neg_logp = nlse - s                              # == -(log_softmax)
    else:
        # Lane-dense path: `groups` logical rows share one 128-lane-aligned
        # slab. Per-group max / logsumexp via masked full-lane reductions --
        # VPU/XLU/EUP filler that hides under the memory stream. Masks are
        # built once and reused between the max and the sum loops.
        lane = jax.lax.broadcasted_iota(jnp.int32, x_in.shape, dimension=1)
        sels = []
        for k in range(groups):
            lo = k * classes
            sels.append((lane >= lo) & (lane < lo + classes))

        neg_inf = jnp.asarray(-jnp.inf, dtype=x_in.dtype)
        m = jnp.zeros(x_in.shape, jnp.float32)
        for k in range(groups):
            mk = jnp.max(jnp.where(sels[k], x_in, neg_inf), axis=-1,
                         keepdims=True).astype(jnp.float32)
            m = jnp.where(sels[k], mk, m)

        s = x_in.astype(jnp.float32) - m
        e = jnp.exp(s)

        nlse = jnp.zeros_like(s)
        for k in range(groups):
            lk = jnp.log(jnp.sum(jnp.where(sels[k], e, 0.0), axis=-1,
                                 keepdims=True))        # log on (tm,1), not (tm,gc)
            nlse = jnp.where(sels[k], lk, nlse)
        neg_logp = nlse - s

    # Load/cast the targets only now (short f32 live range); negation is
    # already folded into neg_logp.
    # NOTE: like the PyTorch reference, a fully masked logit (-inf) paired
    # with a zero target yields 0 * inf = NaN; no extra guard on purpose.
    t = t_ref[...].astype(jnp.float32)
    o_ref[...] = (t * neg_logp).astype(o_ref.dtype)


# --------------------------------------------------------------------------
# Two-pass class-split path for vocab-scale C (C % 128 == 0)
# --------------------------------------------------------------------------
def _lse_kernel(x_ref, lse_ref, m_sc, l_sc):
    """Online max / sum-exp over the class grid axis; writes per-row lse."""
    k = pl.program_id(1)

    @pl.when(k == 0)
    def _():
        m_sc[...] = jnp.full_like(m_sc, -jnp.inf)
        l_sc[...] = jnp.zeros_like(l_sc)

    x = x_ref[...]
    m_blk = jnp.max(x, axis=-1, keepdims=True).astype(jnp.float32)
    m_prev = m_sc[...]
    m_new = jnp.maximum(m_prev, m_blk)
    p = jnp.exp(x.astype(jnp.float32) - m_new)
    l_sc[...] = l_sc[...] * jnp.exp(m_prev - m_new) + jnp.sum(
        p, axis=-1, keepdims=True)
    m_sc[...] = m_new

    @pl.when(k == pl.num_programs(1) - 1)
    def _():
        lse_ref[...] = m_sc[...] + jnp.log(l_sc[...])


def _nll_kernel(x_ref, t_ref, lse_ref, o_ref):
    """Elementwise -t * log_softmax given the precomputed per-row lse."""
    neg_logp = lse_ref[...] - x_ref[...].astype(jnp.float32)
    o_ref[...] = (t_ref[...].astype(jnp.float32) * neg_logp).astype(o_ref.dtype)


def _cross_entropy_class_split(x, t, out_dtype, sublane, vmem_limit_bytes):
    n, c = x.shape
    # Class tile: largest multiple-of-128 divisor of C up to 4096 lanes (so
    # pass-1's max/sum never see padded garbage).
    tc = 128
    d = min(c, 4096)
    d -= d % 128
    while d >= 128:
        if c % d == 0:
            tc = d
            break
        d -= 128

    x_item = jnp.dtype(x.dtype).itemsize
    t_item = jnp.dtype(t.dtype).itemsize
    o_item = jnp.dtype(out_dtype).itemsize

    # Pass 1: stream x only; ~2 full-tile f32 intermediates.
    tm1 = _pick_tile_rows(n, tc * x_item, 2 * tc * 4, sublane, vmem_limit_bytes)
    lse = pl.pallas_call(
        _lse_kernel,
        out_shape=jax.ShapeDtypeStruct((n, 1), jnp.float32),
        grid_spec=pltpu.PrefetchScalarGridSpec(
            num_scalar_prefetch=0,
            grid=(pl.cdiv(n, tm1), c // tc),
            in_specs=[pl.BlockSpec((tm1, tc), lambda i, k: (i, k))],
            out_specs=pl.BlockSpec((tm1, 1), lambda i, k: (i, 0)),
            scratch_shapes=[pltpu.VMEM((tm1, 1), jnp.float32),
                            pltpu.VMEM((tm1, 1), jnp.float32)],
        ),
        compiler_params=pltpu.CompilerParams(
            dimension_semantics=("parallel", "arbitrary"),
            vmem_limit_bytes=vmem_limit_bytes,
        ),
    )(x)

    # Pass 2: elementwise map streaming x, t, out.
    stream2 = tc * (x_item + t_item + o_item)
    tm2 = _pick_tile_rows(n, stream2, 3 * tc * 4, sublane, vmem_limit_bytes)
    out = pl.pallas_call(
        _nll_kernel,
        out_shape=jax.ShapeDtypeStruct((n, c), out_dtype),
        grid_spec=pltpu.PrefetchScalarGridSpec(
            num_scalar_prefetch=0,
            grid=(pl.cdiv(n, tm2), c // tc),
            in_specs=[pl.BlockSpec((tm2, tc), lambda i, k: (i, k)),
                      pl.BlockSpec((tm2, tc), lambda i, k: (i, k)),
                      pl.BlockSpec((tm2, 1), lambda i, k: (i, 0))],
            out_specs=pl.BlockSpec((tm2, tc), lambda i, k: (i, k)),
        ),
        compiler_params=pltpu.CompilerParams(
            dimension_semantics=("parallel", "parallel"),
            vmem_limit_bytes=vmem_limit_bytes,
        ),
    )(x, t, lse)
    return out


# --------------------------------------------------------------------------
# Public entry point
# --------------------------------------------------------------------------
@functools.partial(jax.jit, static_argnames=("out_dtype", "vmem_limit_bytes",
                                             "force_class_split"))
def cross_entropy(inputs, targets, *, out_dtype=None, vmem_limit_bytes=None,
                  force_class_split=False):
    """Elementwise loss map: -targets * log_softmax(inputs, axis=1).

    inputs, targets: (N, C). Returns (N, C) in the promoted input dtype
    (matching torch's `targets * logsoftmax(inputs)` promotion), unless
    `out_dtype` is given.
    """
    assert inputs.ndim == 2 and inputs.shape == targets.shape, (
        "expected matching (N, num_classes) inputs/targets")
    n, c = inputs.shape
    if out_dtype is None:
        out_dtype = jnp.result_type(inputs.dtype, targets.dtype)
    out_dtype = jnp.dtype(out_dtype)
    if vmem_limit_bytes is None:
        vmem_limit_bytes = _default_vmem_limit_bytes()

    sublane = _sublane_multiple(inputs.dtype, targets.dtype, out_dtype)
    x_item = jnp.dtype(inputs.dtype).itemsize
    t_item = jnp.dtype(targets.dtype).itemsize
    o_item = out_dtype.itemsize

    # ---- lane-density fold: pack g consecutive rows into one 128-lane slab --
    # Covers both C < 128 and C >= 128 that is not a multiple of 128, so the
    # output last dim is lane-dense (unmasked full-lane vst).
    g = 1
    if c % 128 != 0:
        cand = 128 // math.gcd(c, 128)
        if cand <= 16 and n % cand == 0:
            g = cand
    rows = n // g
    gc = g * c

    stream_per_row = gc * (x_item + t_item + o_item)        # HBM traffic / row
    interm_per_row = (5 if g > 1 else 3) * gc * 4            # f32 temporaries / row

    # ---- vocab-scale classes: class-axis split with online logsumexp --------
    budget = int(vmem_limit_bytes * 0.75)
    min_block_bytes = sublane * (2 * stream_per_row + interm_per_row)
    if (c % 128 == 0) and (force_class_split or min_block_bytes > budget):
        return _cross_entropy_class_split(inputs, targets, out_dtype, sublane,
                                          vmem_limit_bytes)
    # TODO(synk): vocab-scale C that is NOT a multiple of 128 still uses a
    # single (tm, C) row block; add a masked class-split if that shape matters.

    x2 = inputs.reshape(rows, gc)       # row-major fold: free metadata reshape
    t2 = targets.reshape(rows, gc)

    tm = _pick_tile_rows(rows, stream_per_row, interm_per_row, sublane,
                         vmem_limit_bytes)
    kernel = functools.partial(_cross_entropy_kernel, groups=g, classes=c)

    out2 = pl.pallas_call(
        kernel,
        out_shape=jax.ShapeDtypeStruct((rows, gc), out_dtype),
        grid_spec=pltpu.PrefetchScalarGridSpec(
            num_scalar_prefetch=0,
            grid=(pl.cdiv(rows, tm),),
            in_specs=[pl.BlockSpec((tm, gc), lambda i: (i, 0)),
                      pl.BlockSpec((tm, gc), lambda i: (i, 0))],
            out_specs=pl.BlockSpec((tm, gc), lambda i: (i, 0)),
        ),
        compiler_params=pltpu.CompilerParams(
            dimension_semantics=("parallel",),
            vmem_limit_bytes=vmem_limit_bytes,
        ),
    )(x2, t2)
    return out2.reshape(n, c)


# --------------------------------------------------------------------------
# Self-test
# --------------------------------------------------------------------------
if __name__ == "__main__":
    key = jax.random.PRNGKey(0)
    ks = jax.random.split(key, 8)

    def _ref(x, t):
        xf = x.astype(jnp.float32)
        tf = t.astype(jnp.float32)
        return -tf * jax.nn.log_softmax(xf, axis=1)

    # Case 1: small classifier head, C=32 < 128 -> lane-dense folded path (f32).
    n1, c1 = 16, 32
    x1 = jax.random.normal(ks[0], (n1, c1), dtype=jnp.float32)
    t1 = jax.nn.softmax(jax.random.normal(ks[1], (n1, c1), dtype=jnp.float32), 1)
    o1 = jax.block_until_ready(cross_entropy(x1, t1))
    assert o1.shape == (n1, c1) and o1.dtype == jnp.float32
    assert jnp.allclose(o1, _ref(x1, t1), atol=1e-5, rtol=1e-5)

    # Case 2: bf16 inputs, C multiple of 128 -> plain path, bf16 output stream.
    n2, c2 = 64, 256
    x2 = jax.random.normal(ks[2], (n2, c2), dtype=jnp.float32).astype(jnp.bfloat16)
    t2 = jax.nn.softmax(jax.random.normal(ks[3], (n2, c2), dtype=jnp.float32),
                        1).astype(jnp.bfloat16)
    o2 = jax.block_until_ready(cross_entropy(x2, t2))
    assert o2.shape == (n2, c2) and o2.dtype == jnp.bfloat16
    assert jnp.allclose(o2.astype(jnp.float32), _ref(x2, t2), atol=2e-2, rtol=2e-2)

    # Case 3: C=200 (>=128, not a multiple of 128) -> extended fold (g=16).
    n3, c3 = 32, 200
    x3 = jax.random.normal(ks[4], (n3, c3), dtype=jnp.float32)
    t3 = jax.nn.softmax(jax.random.normal(ks[5], (n3, c3), dtype=jnp.float32), 1)
    o3 = jax.block_until_ready(cross_entropy(x3, t3))
    assert o3.shape == (n3, c3) and o3.dtype == jnp.float32
    assert jnp.allclose(o3, _ref(x3, t3), atol=1e-5, rtol=1e-5)

    # Case 4: class-axis split path (forced at a small, fast-to-test size).
    n4, c4 = 32, 8192
    x4 = jax.random.normal(ks[6], (n4, c4), dtype=jnp.float32)
    t4 = jax.nn.softmax(jax.random.normal(ks[7], (n4, c4), dtype=jnp.float32), 1)
    o4 = jax.block_until_ready(cross_entropy(x4, t4, force_class_split=True))
    assert o4.shape == (n4, c4) and o4.dtype == jnp.float32
    assert jnp.allclose(o4, _ref(x4, t4), atol=1e-5, rtol=1e-5)

    print("KERNEL_OK")
</pallas_src>

<mosaic_0001>
module attributes {stable_mosaic.version = 11 : i64} {
  func.func @_cross_entropy_kernel(%arg0: i32, %arg1: memref<4x128xf32, #tpu.memory_space<vmem>>, %arg2: memref<4x128xf32, #tpu.memory_space<vmem>>, %arg3: memref<4x128xf32, #tpu.memory_space<vmem>>) attributes {dimension_semantics = [#tpu.dimension_semantics<parallel>], iteration_bounds = array<i64: 1>, scalar_prefetch = 0 : i64, scratch_operands = 0 : i64, tpu.core_type = #tpu.core_type<tc>, window_params = [{transform_indices = @transform_0, window_bounds = array<i64: 4, 128>}, {transform_indices = @transform_1, window_bounds = array<i64: 4, 128>}, {transform_indices = @transform_2, window_bounds = array<i64: 4, 128>}]} {
    %c0 = arith.constant 0 : index
    %c0_0 = arith.constant 0 : index
    %0 = vector.load %arg1[%c0, %c0_0] : memref<4x128xf32, #tpu.memory_space<vmem>>, vector<4x128xf32>
    %1 = tpu.iota {dimensions = array<i32: 1>} : vector<4x128xi32>
    %c0_i32 = arith.constant 0 : i32
    %2 = vector.broadcast %c0_i32 : i32 to vector<4x128xi32>
    %3 = arith.cmpi sge, %1, %2 : vector<4x128xi32>
    %c32_i32 = arith.constant 32 : i32
    %4 = vector.broadcast %c32_i32 : i32 to vector<4x128xi32>
    %5 = arith.cmpi slt, %1, %4 : vector<4x128xi32>
    %6 = arith.andi %3, %5 : vector<4x128xi1>
    %c32_i32_1 = arith.constant 32 : i32
    %7 = vector.broadcast %c32_i32_1 : i32 to vector<4x128xi32>
    %8 = arith.cmpi sge, %1, %7 : vector<4x128xi32>
    %c64_i32 = arith.constant 64 : i32
    %9 = vector.broadcast %c64_i32 : i32 to vector<4x128xi32>
    %10 = arith.cmpi slt, %1, %9 : vector<4x128xi32>
    %11 = arith.andi %8, %10 : vector<4x128xi1>
    %c64_i32_2 = arith.constant 64 : i32
    %12 = vector.broadcast %c64_i32_2 : i32 to vector<4x128xi32>
    %13 = arith.cmpi sge, %1, %12 : vector<4x128xi32>
    %c96_i32 = arith.constant 96 : i32
    %14 = vector.broadcast %c96_i32 : i32 to vector<4x128xi32>
    %15 = arith.cmpi slt, %1, %14 : vector<4x128xi32>
    %16 = arith.andi %13, %15 : vector<4x128xi1>
    %c96_i32_3 = arith.constant 96 : i32
    %17 = vector.broadcast %c96_i32_3 : i32 to vector<4x128xi32>
    %18 = arith.cmpi sge, %1, %17 : vector<4x128xi32>
    %c128_i32 = arith.constant 128 : i32
    %19 = vector.broadcast %c128_i32 : i32 to vector<4x128xi32>
    %20 = arith.cmpi slt, %1, %19 : vector<4x128xi32>
    %21 = arith.andi %18, %20 : vector<4x128xi1>
    %cst = arith.constant 0.000000e+00 : f32
    %22 = vector.broadcast %cst : f32 to vector<4x128xf32>
    %cst_4 = arith.constant 0xFF800000 : f32
    %23 = vector.broadcast %cst_4 : f32 to vector<4x128xf32>
    %24 = arith.select %6, %0, %23 : vector<4x128xi1>, vector<4x128xf32>
    %cst_5 = arith.constant dense<0xFF800000> : vector<4xf32>
    %25 = vector.multi_reduction <maximumf>, %24, %cst_5 [1] : vector<4x128xf32> to vector<4xf32>
    %26 = vector.shape_cast %25 : vector<4xf32> to vector<4x1xf32>
    %27 = vector.shape_cast %26 : vector<4x1xf32> to vector<4x1xf32>
    %28 = vector.broadcast %27 : vector<4x1xf32> to vector<4x128xf32>
    %29 = arith.select %6, %28, %22 : vector<4x128xi1>, vector<4x128xf32>
    %cst_6 = arith.constant 0xFF800000 : f32
    %30 = vector.broadcast %cst_6 : f32 to vector<4x128xf32>
    %31 = arith.select %11, %0, %30 : vector<4x128xi1>, vector<4x128xf32>
    %cst_7 = arith.constant dense<0xFF800000> : vector<4xf32>
    %32 = vector.multi_reduction <maximumf>, %31, %cst_7 [1] : vector<4x128xf32> to vector<4xf32>
    %33 = vector.shape_cast %32 : vector<4xf32> to vector<4x1xf32>
    %34 = vector.shape_cast %33 : vector<4x1xf32> to vector<4x1xf32>
    %35 = vector.broadcast %34 : vector<4x1xf32> to vector<4x128xf32>
    %36 = arith.select %11, %35, %29 : vector<4x128xi1>, vector<4x128xf32>
    %cst_8 = arith.constant 0xFF800000 : f32
    %37 = vector.broadcast %cst_8 : f32 to vector<4x128xf32>
    %38 = arith.select %16, %0, %37 : vector<4x128xi1>, vector<4x128xf32>
    %cst_9 = arith.constant dense<0xFF800000> : vector<4xf32>
    %39 = vector.multi_reduction <maximumf>, %38, %cst_9 [1] : vector<4x128xf32> to vector<4xf32>
    %40 = vector.shape_cast %39 : vector<4xf32> to vector<4x1xf32>
    %41 = vector.shape_cast %40 : vector<4x1xf32> to vector<4x1xf32>
    %42 = vector.broadcast %41 : vector<4x1xf32> to vector<4x128xf32>
    %43 = arith.select %16, %42, %36 : vector<4x128xi1>, vector<4x128xf32>
    %cst_10 = arith.constant 0xFF800000 : f32
    %44 = vector.broadcast %cst_10 : f32 to vector<4x128xf32>
    %45 = arith.select %21, %0, %44 : vector<4x128xi1>, vector<4x128xf32>
    %cst_11 = arith.constant dense<0xFF800000> : vector<4xf32>
    %46 = vector.multi_reduction <maximumf>, %45, %cst_11 [1] : vector<4x128xf32> to vector<4xf32>
    %47 = vector.shape_cast %46 : vector<4xf32> to vector<4x1xf32>
    %48 = vector.shape_cast %47 : vector<4x1xf32> to vector<4x1xf32>
    %49 = vector.broadcast %48 : vector<4x1xf32> to vector<4x128xf32>
    %50 = arith.select %21, %49, %43 : vector<4x128xi1>, vector<4x128xf32>
    %51 = arith.subf %0, %50 : vector<4x128xf32>
    %52 = math.exp %51 : vector<4x128xf32>
    %cst_12 = arith.constant 0.000000e+00 : f32
    %53 = vector.broadcast %cst_12 : f32 to vector<4x128xf32>
    %cst_13 = arith.constant 0.000000e+00 : f32
    %54 = vector.broadcast %cst_13 : f32 to vector<4x128xf32>
    %55 = arith.select %6, %52, %54 : vector<4x128xi1>, vector<4x128xf32>
    %cst_14 = arith.constant dense<0.000000e+00> : vector<4xf32>
    %56 = vector.multi_reduction <add>, %55, %cst_14 [1] : vector<4x128xf32> to vector<4xf32>
    %57 = vector.shape_cast %56 : vector<4xf32> to vector<4x1xf32>
    %58 = math.log %57 : vector<4x1xf32>
    %59 = vector.shape_cast %58 : vector<4x1xf32> to vector<4x1xf32>
    %60 = vector.broadcast %59 : vector<4x1xf32> to vector<4x128xf32>
    %61 = arith.select %6, %60, %53 : vector<4x128xi1>, vector<4x128xf32>
    %cst_15 = arith.constant 0.000000e+00 : f32
    %62 = vector.broadcast %cst_15 : f32 to vector<4x128xf32>
    %63 = arith.select %11, %52, %62 : vector<4x128xi1>, vector<4x128xf32>
    %cst_16 = arith.constant dense<0.000000e+00> : vector<4xf32>
    %64 = vector.multi_reduction <add>, %63, %cst_16 [1] : vector<4x128xf32> to vector<4xf32>
    %65 = vector.shape_cast %64 : vector<4xf32> to vector<4x1xf32>
    %66 = math.log %65 : vector<4x1xf32>
    %67 = vector.shape_cast %66 : vector<4x1xf32> to vector<4x1xf32>
    %68 = vector.broadcast %67 : vector<4x1xf32> to vector<4x128xf32>
    %69 = arith.select %11, %68, %61 : vector<4x128xi1>, vector<4x128xf32>
    %cst_17 = arith.constant 0.000000e+00 : f32
    %70 = vector.broadcast %cst_17 : f32 to vector<4x128xf32>
    %71 = arith.select %16, %52, %70 : vector<4x128xi1>, vector<4x128xf32>
    %cst_18 = arith.constant dense<0.000000e+00> : vector<4xf32>
    %72 = vector.multi_reduction <add>, %71, %cst_18 [1] : vector<4x128xf32> to vector<4xf32>
    %73 = vector.shape_cast %72 : vector<4xf32> to vector<4x1xf32>
    %74 = math.log %73 : vector<4x1xf32>
    %75 = vector.shape_cast %74 : vector<4x1xf32> to vector<4x1xf32>
    %76 = vector.broadcast %75 : vector<4x1xf32> to vector<4x128xf32>
    %77 = arith.select %16, %76, %69 : vector<4x128xi1>, vector<4x128xf32>
    %cst_19 = arith.constant 0.000000e+00 : f32
    %78 = vector.broadcast %cst_19 : f32 to vector<4x128xf32>
    %79 = arith.select %21, %52, %78 : vector<4x128xi1>, vector<4x128xf32>
    %cst_20 = arith.constant dense<0.000000e+00> : vector<4xf32>
    %80 = vector.multi_reduction <add>, %79, %cst_20 [1] : vector<4x128xf32> to vector<4xf32>
    %81 = vector.shape_cast %80 : vector<4xf32> to vector<4x1xf32>
    %82 = math.log %81 : vector<4x1xf32>
    %83 = vector.shape_cast %82 : vector<4x1xf32> to vector<4x1xf32>
    %84 = vector.broadcast %83 : vector<4x1xf32> to vector<4x128xf32>
    %85 = arith.select %21, %84, %77 : vector<4x128xi1>, vector<4x128xf32>
    %86 = arith.subf %85, %51 : vector<4x128xf32>
    %c0_21 = arith.constant 0 : index
    %c0_22 = arith.constant 0 : index
    %87 = vector.load %arg2[%c0_21, %c0_22] : memref<4x128xf32, #tpu.memory_space<vmem>>, vector<4x128xf32>
    %88 = arith.mulf %87, %86 : vector<4x128xf32>
    %c0_23 = arith.constant 0 : index
    %c0_24 = arith.constant 0 : index
    %89 = vector.load %arg3[%c0_23, %c0_24] : memref<4x128xf32, #tpu.memory_space<vmem>>, vector<4x128xf32>
    tpu.vector_store %arg3[%c0_23, %c0_24], %88 {strides = array<i32>} : memref<4x128xf32, #tpu.memory_space<vmem>>, vector<4x128xf32>,
    return
  }
  func.func @transform_0(%arg0: i32) -> (i32, i32) {
    %c0_i32 = arith.constant 0 : i32
    %c0_i32_0 = arith.constant 0 : i32
    return %arg0, %c0_i32 : i32, i32
  }
  func.func @transform_1(%arg0: i32) -> (i32, i32) {
    %c0_i32 = arith.constant 0 : i32
    %c0_i32_0 = arith.constant 0 : i32
    return %arg0, %c0_i32 : i32, i32
  }
  func.func @transform_2(%arg0: i32) -> (i32, i32) {
    %c0_i32 = arith.constant 0 : i32
    %c0_i32_0 = arith.constant 0 : i32
    return %arg0, %c0_i32 : i32, i32
  }
}

</mosaic_0001>

<bundles_post_ra>
// kernel: cross_entropy.1
= control target key start
LH: loop header
LB: loop body
LE: loop exit
PB: predicated region body
PF: predicated region fallthrough
CT: control target
= control target key end

     0   :  { %v12_v0 = vlaneseq  ;;  %vm27_vm0 = vcmask 1043456   ;;  %s176_s0 = inlined_call_operand.vmem [shape: f32[4,128], index: 0, kind: input, shape index: {}]   ;;  %s177_s1 = inlined_call_operand.vmem [shape: f32[4,128], index: 1, kind: input, shape index: {}]   ;;  %s178_s2 = inlined_call_operand.vmem [shape: f32[4,128], index: 2, kind: output, shape index: {}]  }
   0x1   :  { %v11_v1 = vld [vmem:[%s176_s0] sm:$0xf] }
   0x2   :  { %v114_v2 = vand.u32 127, %v12_v0  ;;  %v79_v47 = vld [vmem:[%s177_s1] sm:$0xf] }
   0x4   :  { %vm15_vm1 = vcmp.lt.s32.totalorder %v114_v2, 32  ;;  %vm20_vm2 = vcmp.ge.s32.totalorder %v114_v2, 64  ;;  %vm21_vm3 = vcmp.lt.s32.totalorder %v114_v2, 96  ;;  %vm17_vm4 = vcmp.ge.s32.totalorder %v114_v2, 32 }
   0x5   :  { %v26_v3 = vsel %vm15_vm1, %v11_v1, -inf  ;;  %vm122_vm5 = vmand %vm20_vm2, %vm21_vm3  ;;  %vm18_vm6 = vcmp.lt.s32.totalorder %v114_v2, 64  ;;  %vm23_vm7 = vcmp.ge.s32.totalorder %v114_v2, 96 }
   0x6   :  { %v28_v5 = vsel %vm27_vm0, %v26_v3, -inf  ;;  %v37_v6 = vsel %vm122_vm5, %v11_v1, -inf  ;;  %vm131_vm8 = vmand %vm17_vm4, %vm18_vm6  ;;  %v42_v8 = vsel %vm23_vm7, %v11_v1, -inf }
   0x7   :  { %29 = vmax.xlane.f32.xlu0 %v28_v5  ;;  %v38_v9 = vsel %vm27_vm0, %v37_v6, -inf  ;;  %v32_v10 = vsel %vm131_vm8, %v11_v1, -inf  ;;  %v43_v12 = vsel %vm27_vm0, %v42_v8, -inf }
   0x8   :  { %39 = vmax.xlane.f32.xlu1 %v38_v9  ;;  %v33_v11 = vsel %vm27_vm0, %v32_v10, -inf }
   0xb   :  { %34 = vmax.xlane.f32.xlu0 %v33_v11 }
   0xc   :  { %44 = vmax.xlane.f32.xlu1 %v43_v12 }
  0x94   :  { %v30_v13 = vpop.xlane.xlu0 %29 }
  0x95   :  { %v40_v14 = vpop.xlane.xlu1 %39  ;;  %v31_v15 = vsel %vm15_vm1, %v30_v13, 0.0 }
  0x98   :  { %v35_v16 = vpop.xlane.xlu0 %34 }
  0x99   :  { %v36_v17 = vsel %vm131_vm8, %v35_v16, %v31_v15  ;;  %v45_v18 = vpop.xlane.xlu1 %44 }
  0x9a   :  { %v41_v19 = vsel %vm122_vm5, %v40_v14, %v36_v17 }
  0x9b   :  { %v46_v20 = vsel %vm23_vm7, %v45_v18, %v41_v19 }
  0x9c   :  { %v47_v21 = vsub.f32 %v11_v1, %v46_v20 }
  0x9e   :  { %v48_v22 = vmul.f32 1.442695, %v47_v21 }
  0xa0   :  { %86 = vpow2.f32 %v48_v22 }
  0xaa   :  { %v87_v23 = vpop.eup %86 }
  0xab   :  { %v57_v24 = vsel %vm131_vm8, %v87_v23, 0.0  ;;  %v50_v25 = vsel %vm15_vm1, %v87_v23, 0.0  ;;  %v71_v28 = vsel %vm23_vm7, %v87_v23, 0.0  ;;  %v64_v29 = vsel %vm122_vm5, %v87_v23, 0.0 }
  0xac   :  { %v58_v26 = vsel %vm27_vm0, %v57_v24, 0.0  ;;  %v51_v27 = vsel %vm27_vm0, %v50_v25, 0.0  ;;  %v72_v30 = vsel %vm27_vm0, %v71_v28, 0.0  ;;  %v65_v31 = vsel %vm27_vm0, %v64_v29, 0.0 }
  0xad   :  { %59 = vadd.xlane.f32.xlu1 %v58_v26  ;;  %52 = vadd.xlane.f32.xlu0 %v51_v27 }
  0xb1   :  { %73 = vadd.xlane.f32.xlu1 %v72_v30  ;;  %66 = vadd.xlane.f32.xlu0 %v65_v31 }
 0x13a   :  { %v60_v32 = vpop.xlane.xlu1 %59  ;;  %v53_v33 = vpop.xlane.xlu0 %52 }
 0x13b   :  { %88 = vlog2.f32 %v60_v32 }
 0x13c   :  { %90 = vlog2.f32 %v53_v33 }
 0x13e   :  { %v74_v34 = vpop.xlane.xlu1 %73  ;;  %v67_v35 = vpop.xlane.xlu0 %66 }
 0x13f   :  { %92 = vlog2.f32 %v74_v34 }
 0x140   :  { %94 = vlog2.f32 %v67_v35 }
 0x145   :  { %v89_v36 = vpop.eup %88 }
 0x146   :  { %v91_v37 = vpop.eup %90  ;;  %v62_v39 = vmul.f32 0.6931472, %v89_v36 }
 0x147   :  { %v55_v38 = vmul.f32 0.6931472, %v91_v37 }
 0x149   :  { %v93_v40 = vpop.eup %92  ;;  %v56_v41 = vsel %vm15_vm1, %v55_v38, 0.0 }
 0x14a   :  { %v95_v42 = vpop.eup %94  ;;  %v76_v43 = vmul.f32 0.6931472, %v93_v40  ;;  %v63_v45 = vsel %vm131_vm8, %v62_v39, %v56_v41 }
 0x14b   :  { %v69_v44 = vmul.f32 0.6931472, %v95_v42 }
 0x14d   :  { %v70_v46 = vsel %vm122_vm5, %v69_v44, %v63_v45 }
 0x14e   :  { %v77_v48 = vsel %vm23_vm7, %v76_v43, %v70_v46 }
 0x14f   :  { %v78_v49 = vsub.f32 %v77_v48, %v47_v21 }
 0x151   :  { %v80_v50 = vmul.f32 %v79_v47, %v78_v49 }
 0x153   :  { %81 = vst [vmem:[%s178_s2] sm:$0xf] %v80_v50 }

</bundles_post_ra>
